<compile_context>
chip_gen: v5e
topology: v5e:2x2
jax: 0.10.0
libtpu: 0.0.40
codegen_flags: <defaults>
</compile_context>

<pallas_src>
import functools
import math

import jax
import jax.numpy as jnp
from jax.experimental import pallas as pl
from jax.experimental.pallas import tpu as pltpu


def _round_up(x, m):
    return (x + m - 1) // m * m


# ----------------------------------------------------------------------------- kernels
def _stats_kernel(x_ref, w_ref, sum_ref, sq_ref, *, tile_rows, valid_rows, mask_tail):
    """Pass 1: per-tile partial BatchNorm statistics of Y = X @ W (Y never stored)."""
    y = jnp.dot(x_ref[...], w_ref[...], preferred_element_type=jnp.float32)
    if mask_tail:
        row = jax.lax.broadcasted_iota(jnp.int32, y.shape, 0) + pl.program_id(0) * tile_rows
        y = jnp.where(row < valid_rows, y, 0.0)
    sum_ref[...] = jnp.sum(y, axis=0, keepdims=True)[None]
    sq_ref[...] = jnp.sum(y * y, axis=0, keepdims=True)[None]


def _bn_relu_kernel(x_ref, w_ref, scale_ref, shift_ref, o_ref):
    """Pass 2: recompute Y = X @ W (f32 accumulate), fuse BN affine + ReLU, store."""
    y = jnp.dot(x_ref[...], w_ref[...], preferred_element_type=jnp.float32)
    o_ref[...] = jnp.maximum(y * scale_ref[...] + shift_ref[...], 0.0).astype(o_ref.dtype)


# ----------------------------------------------------------------------------- wrapper
def upconv_forward(x, weight, bias, gamma, beta, *, eps=1e-5, tile_rows=1024,
                   compute_dtype=jnp.bfloat16, out_dtype=jnp.float32):
    """x: (N, Cin, H, W) f32. weight: (Cin, Cout, 2, 2) (PyTorch ConvTranspose2d layout).

    `bias` is accepted for interface parity but not applied: a bias added before a
    training-mode BatchNorm is exactly cancelled by the mean subtraction.
    """
    del bias  # mathematically cancelled by BatchNorm's batch-mean subtraction
    N, Cin, H, W = x.shape
    Cout = weight.shape[1]
    C4 = 4 * Cout
    M = N * H * W

    # ---- lane-dense columns: kron re-blocking for small channels, column padding
    #      for large Cin (avoids k x MXU work / k^2 x weight bytes) ----------------
    k = 128 // math.gcd(C4, 128)          # k == 1 when C4 is already 128-aligned
    if k > 1 and Cin >= 128:
        k = 1
    per_block = C4 if k > 1 else _round_up(C4, 128)
    Ccols = k * per_block
    KCin = k * Cin

    # ---- X to kernel layout: cast first so the XLA relayout moves 2 B/elem -------
    xm = jnp.transpose(x.astype(compute_dtype), (0, 2, 3, 1)).reshape(M, Cin)
    Mk = -(-M // k)
    if M % k:
        xm = jnp.pad(xm, ((0, Mk * k - M), (0, 0)))   # rare; zero rows add 0 to stats
    x2 = xm.reshape(Mk, KCin)                          # free row-major reshape

    # ---- weight: (Cin, Cout, 2, 2) -> (Cin, C4), columns ordered (cout, kh, kw) ---
    wm = weight.reshape(Cin, C4)
    if k > 1:
        w2 = jnp.kron(jnp.eye(k, dtype=wm.dtype), wm)          # block-diagonal
    else:
        w2 = jnp.pad(wm, ((0, 0), (0, Ccols - C4)))            # zero-padded columns
    w2 = w2.astype(compute_dtype)

    # ---- tile_rows: multiple of 16, >= 2 tiles when possible, VMEM-bounded --------
    out_bytes = jax.dtypes.canonicalize_dtype(out_dtype).itemsize
    t = max(16, _round_up(int(tile_rows), 16))
    if Mk > 16:
        t = min(t, _round_up(-(-Mk // 2), 16))   # at least 2 tiles -> both v7x cores busy

    def _step_vmem(tt):   # double-buffered x/out + weight + f32 accumulator headroom
        return (2 * tt * KCin * 2 + 2 * KCin * Ccols * 2
                + 2 * tt * Ccols * out_bytes + 2 * tt * Ccols * 4 + 4 * Ccols * 4)

    while t > 16 and _step_vmem(t) > 40 * 1024 * 1024:
        t -= 16
    if t >= Mk:
        t = Mk                                    # full-extent block is always legal
    tile_rows = t
    num_tiles = -(-Mk // tile_rows)
    mask_tail = (Mk % tile_rows) != 0

    cparams = pltpu.CompilerParams(
        dimension_semantics=("parallel",),
        vmem_limit_bytes=48 * 1024 * 1024,        # headroom on v7x's 64 MiB VMEM
    )
    grid = (num_tiles,)
    x_spec = pl.BlockSpec((tile_rows, KCin), lambda i: (i, 0))
    # Weight block is small after the k-cap (<= a few MiB); default double buffering
    # of this grid-invariant operand is cheap, so no pl.Buffered(1) hint is needed.
    w_spec = pl.BlockSpec((KCin, Ccols), lambda i: (0, 0))

    # ---- pass 1: partial BN statistics only (no Y HBM round trip) -----------------
    psum, psq = pl.pallas_call(
        functools.partial(_stats_kernel, tile_rows=tile_rows, valid_rows=Mk,
                          mask_tail=mask_tail),
        out_shape=(
            jax.ShapeDtypeStruct((num_tiles, 1, Ccols), jnp.float32),
            jax.ShapeDtypeStruct((num_tiles, 1, Ccols), jnp.float32),
        ),
        grid_spec=pltpu.PrefetchScalarGridSpec(
            num_scalar_prefetch=0, grid=grid,
            in_specs=[x_spec, w_spec],
            out_specs=[
                pl.BlockSpec((1, 1, Ccols), lambda i: (i, 0, 0)),
                pl.BlockSpec((1, 1, Ccols), lambda i: (i, 0, 0)),
            ],
        ),
        compiler_params=cparams,
    )(x2, w2)

    # ---- O(Cout) glue: combine partials -> per-column BN affine -------------------
    # TODO(synk): single-pass E[y^2]-E[y]^2 can cancel when |mean| >> std; clamped >=0.
    count = jnp.float32(4 * M)
    col_sum = jnp.sum(psum, axis=(0, 1)).reshape(k, per_block)[:, :C4].sum(axis=0)
    col_sq = jnp.sum(psq, axis=(0, 1)).reshape(k, per_block)[:, :C4].sum(axis=0)
    ch_sum = col_sum.reshape(Cout, 4).sum(axis=1)
    ch_sq = col_sq.reshape(Cout, 4).sum(axis=1)
    mean = ch_sum / count
    var = jnp.maximum(ch_sq / count - mean * mean, 0.0)   # biased variance (train-mode BN)
    inv = gamma * jax.lax.rsqrt(var + eps)
    sc = jnp.repeat(inv, 4)
    sh = jnp.repeat(beta - mean * inv, 4)
    if per_block > C4:
        sc = jnp.pad(sc, (0, per_block - C4))
        sh = jnp.pad(sh, (0, per_block - C4))
    scale_cols = jnp.tile(sc, k).reshape(1, Ccols).astype(jnp.float32)
    shift_cols = jnp.tile(sh, k).reshape(1, Ccols).astype(jnp.float32)

    # ---- pass 2: recompute X @ W, fuse BN affine + ReLU, lane-dense store ---------
    out2 = pl.pallas_call(
        _bn_relu_kernel,
        out_shape=jax.ShapeDtypeStruct((Mk, Ccols), out_dtype),
        grid_spec=pltpu.PrefetchScalarGridSpec(
            num_scalar_prefetch=0, grid=grid,
            in_specs=[
                x_spec, w_spec,
                pl.BlockSpec((1, Ccols), lambda i: (0, 0)),
                pl.BlockSpec((1, Ccols), lambda i: (0, 0)),
            ],
            out_specs=pl.BlockSpec((tile_rows, Ccols), lambda i: (i, 0)),
        ),
        compiler_params=cparams,
    )(x2, w2, scale_cols, shift_cols)

    # ---- XLA glue: scatter the 2x2 patches back to NCHW ---------------------------
    # TODO(synk): this transpose is the last non-kernel HBM round trip; emitting NHWC
    # (channels-last) directly would remove it but needs an in-kernel (Cout, 2h, 2w)
    # relayout that Mosaic handles poorly at these shapes.
    y4 = out2.reshape(Mk * k, per_block)[:M, :C4]
    out = y4.reshape(N, H, W, Cout, 2, 2)
    out = jnp.transpose(out, (0, 3, 1, 4, 2, 5)).reshape(N, Cout, 2 * H, 2 * W)
    return out


# ----------------------------------------------------------------------------- reference
def _ref_forward(x, weight, bias, gamma, beta, eps=1e-5):
    """Plain-JAX reference: ConvTranspose2d(k=2,s=2) + BatchNorm2d(train) + ReLU."""
    N, Cin, H, W = x.shape
    Cout = weight.shape[1]
    y = jnp.einsum('ncij,ckhw->nkihjw', x, weight,
                   precision=jax.lax.Precision.HIGHEST)
    y = y.reshape(N, Cout, 2 * H, 2 * W) + bias[None, :, None, None]
    mean = jnp.mean(y, axis=(0, 2, 3), keepdims=True)
    var = jnp.mean((y - mean) ** 2, axis=(0, 2, 3), keepdims=True)
    yhat = (y - mean) * jax.lax.rsqrt(var + eps)
    out = yhat * gamma[None, :, None, None] + beta[None, :, None, None]
    return jnp.maximum(out, 0.0)


if __name__ == "__main__":
    key = jax.random.PRNGKey(0)
    k_x, k_w, k_b, k_g, k_be = jax.random.split(key, 5)

    N, Cin, Cout, H, W = 2, 8, 4, 16, 16   # M = N*H*W = 512

    x = jax.random.normal(k_x, (N, Cin, H, W), dtype=jnp.float32)
    weight = 0.1 * jax.random.normal(k_w, (Cin, Cout, 2, 2), dtype=jnp.float32)
    bias = 0.1 * jax.random.normal(k_b, (Cout,), dtype=jnp.float32)
    gamma = 1.0 + 0.1 * jax.random.normal(k_g, (Cout,), dtype=jnp.float32)
    beta = 0.1 * jax.random.normal(k_be, (Cout,), dtype=jnp.float32)

    # 1) default path: kron re-blocking (k=8), 2 row tiles, f32 output
    ref = _ref_forward(x, weight, bias, gamma, beta)
    out = jax.block_until_ready(upconv_forward(x, weight, bias, gamma, beta))
    assert out.shape == (N, Cout, 2 * H, 2 * W), out.shape
    err = float(jnp.max(jnp.abs(out - ref)))
    assert jnp.allclose(out, ref, atol=5e-2, rtol=5e-2), err

    # 2) ragged grid (Mk % tile_rows != 0, in-kernel row mask) + bf16 output path
    x_b = jax.random.normal(k_x, (2, Cin, 10, 10), dtype=jnp.float32)
    ref_b = _ref_forward(x_b, weight, bias, gamma, beta)
    out_b = jax.block_until_ready(
        upconv_forward(x_b, weight, bias, gamma, beta, tile_rows=16,
                       out_dtype=jnp.bfloat16)).astype(jnp.float32)
    err_b = float(jnp.max(jnp.abs(out_b - ref_b)))
    assert jnp.allclose(out_b, ref_b, atol=1e-1, rtol=1e-1), err_b

    # 3) large-Cin path: kron re-blocking bypassed, weight columns padded to 128
    k_x2, k_w2 = jax.random.split(k_x, 2)
    x_l = jax.random.normal(k_x2, (1, 128, 8, 8), dtype=jnp.float32)
    w_l = 0.05 * jax.random.normal(k_w2, (128, Cout, 2, 2), dtype=jnp.float32)
    ref_l = _ref_forward(x_l, w_l, bias, gamma, beta)
    out_l = jax.block_until_ready(upconv_forward(x_l, w_l, bias, gamma, beta))
    err_l = float(jnp.max(jnp.abs(out_l - ref_l)))
    assert jnp.allclose(out_l, ref_l, atol=5e-2, rtol=5e-2), err_l

    print("KERNEL_OK")
</pallas_src>

<mosaic_0001>
module attributes {stable_mosaic.version = 11 : i64} {
  func.func @_stats_kernel(%arg0: i32, %arg1: memref<32x64xbf16, #tpu.memory_space<vmem>>, %arg2: memref<64x128xbf16, #tpu.memory_space<vmem>>, %arg3: memref<1x1x128xf32, #tpu.memory_space<vmem>>, %arg4: memref<1x1x128xf32, #tpu.memory_space<vmem>>) attributes {dimension_semantics = [#tpu.dimension_semantics<parallel>], iteration_bounds = array<i64: 2>, scalar_prefetch = 0 : i64, scratch_operands = 0 : i64, tpu.core_type = #tpu.core_type<tc>, window_params = [{transform_indices = @transform_0, window_bounds = array<i64: 32, 64>}, {pipeline_mode = #tpu.pipeline_mode<synchronous>, transform_indices = @transform_1, window_bounds = array<i64: 64, 128>}, {transform_indices = @transform_2, window_bounds = array<i64: 1, 1, 128>}, {transform_indices = @transform_3, window_bounds = array<i64: 1, 1, 128>}]} {
    %c0 = arith.constant 0 : index
    %c0_0 = arith.constant 0 : index
    %0 = vector.load %arg1[%c0, %c0_0] : memref<32x64xbf16, #tpu.memory_space<vmem>>, vector<32x64xbf16>
    %c0_1 = arith.constant 0 : index
    %c0_2 = arith.constant 0 : index
    %1 = vector.load %arg2[%c0_1, %c0_2] : memref<64x128xbf16, #tpu.memory_space<vmem>>, vector<64x128xbf16>
    %cst = arith.constant dense<0.000000e+00> : vector<32x128xf32>
    %2 = tpu.matmul %0, %1, %cst {dimension_numbers = #tpu.dot_dimension_numbers<[1], [0], [0], [1], [0, 0, 1, 1], [], []>} : vector<32x64xbf16>, vector<64x128xbf16>, vector<32x128xf32> -> vector<32x128xf32>
    %cst_3 = arith.constant dense<0.000000e+00> : vector<128xf32>
    %3 = vector.multi_reduction <add>, %2, %cst_3 [0] : vector<32x128xf32> to vector<128xf32>
    %4 = vector.shape_cast %3 : vector<128xf32> to vector<1x128xf32>
    %5 = vector.shape_cast %4 : vector<1x128xf32> to vector<1x1x128xf32>
    %c0_4 = arith.constant 0 : index
    %c0_5 = arith.constant 0 : index
    %c0_6 = arith.constant 0 : index
    %6 = vector.load %arg3[%c0_4, %c0_5, %c0_6] : memref<1x1x128xf32, #tpu.memory_space<vmem>>, vector<1x1x128xf32>
    tpu.vector_store %arg3[%c0_4, %c0_5, %c0_6], %5 {strides = array<i32>} : memref<1x1x128xf32, #tpu.memory_space<vmem>>, vector<1x1x128xf32>,
    %7 = arith.mulf %2, %2 : vector<32x128xf32>
    %cst_7 = arith.constant dense<0.000000e+00> : vector<128xf32>
    %8 = vector.multi_reduction <add>, %7, %cst_7 [0] : vector<32x128xf32> to vector<128xf32>
    %9 = vector.shape_cast %8 : vector<128xf32> to vector<1x128xf32>
    %10 = vector.shape_cast %9 : vector<1x128xf32> to vector<1x1x128xf32>
    %c0_8 = arith.constant 0 : index
    %c0_9 = arith.constant 0 : index
    %c0_10 = arith.constant 0 : index
    %11 = vector.load %arg4[%c0_8, %c0_9, %c0_10] : memref<1x1x128xf32, #tpu.memory_space<vmem>>, vector<1x1x128xf32>
    tpu.vector_store %arg4[%c0_8, %c0_9, %c0_10], %10 {strides = array<i32>} : memref<1x1x128xf32, #tpu.memory_space<vmem>>, vector<1x1x128xf32>,
    return
  }
  func.func @transform_0(%arg0: i32) -> (i32, i32) {
    %c0_i32 = arith.constant 0 : i32
    %c0_i32_0 = arith.constant 0 : i32
    return %arg0, %c0_i32 : i32, i32
  }
  func.func @transform_1(%arg0: i32) -> (i32, i32) {
    %c0_i32 = arith.constant 0 : i32
    %c0_i32_0 = arith.constant 0 : i32
    %c0_i32_1 = arith.constant 0 : i32
    return %c0_i32, %c0_i32_0 : i32, i32
  }
  func.func @transform_2(%arg0: i32) -> (i32, i32, i32) {
    %c0_i32 = arith.constant 0 : i32
    %c0_i32_0 = arith.constant 0 : i32
    %c0_i32_1 = arith.constant 0 : i32
    return %arg0, %c0_i32, %c0_i32_0 : i32, i32, i32
  }
  func.func @transform_3(%arg0: i32) -> (i32, i32, i32) {
    %c0_i32 = arith.constant 0 : i32
    %c0_i32_0 = arith.constant 0 : i32
    %c0_i32_1 = arith.constant 0 : i32
    return %arg0, %c0_i32, %c0_i32_0 : i32, i32, i32
  }
}

</mosaic_0001>

<bundles_post_ra>
// kernel: tpu_custom_call.1
= control target key start
LH: loop header
LB: loop body
LE: loop exit
PB: predicated region body
PF: predicated region fallthrough
CT: control target
= control target key end

     0   :  { %9 = vsyncpa [#allocation3], 0  ;;  %s928_s0 = inlined_call_operand.hbm [shape: bf16[64,64], index: 0, kind: input, shape index: {}]   ;;  %s929_s1 = inlined_call_operand.hbm [shape: bf16[64,128], index: 1, kind: input, shape index: {}]   ;;  %s930_s2 = inlined_call_operand.hbm [shape: f32[2,1,128], index: 2, kind: output, shape index: {0}]   ;;  %s931_s3 = inlined_call_operand.hbm [shape: f32[2,1,128], index: 3, kind: output, shape index: {1}]  }
   0x1   :  { %11 = vsyncpa [#allocation3 + $0x1], 0 }
   0x2   :  { %12 = vsyncpa [#allocation6], 0 }
   0x3   :  { %13 = vsyncpa [#allocation4], 0 }
   0x4   :  { %15 = vsyncpa [#allocation4 + $0x1], 0 }
   0x5   :  { %16 = vsyncpa [#allocation9], 0 }
   0x6   :  { %18 = vsyncpa [#allocation9 + $0x1], 0  ;;  %s749_s12 = smov 0   ;;  %s751_s13 = smov 0  }
   0x7   :  { %s753_s14 = smov 0   ;;  %s755_s15 = smov 0  }
   0x8 LB: > { %s770_s16 = sadd.s32 4294967295, %s724_s15   ;;  %s449_s17 = sadd.s32 4294967294, %s724_s15   ;;  %s724_s15 = sphi %s755_s15, %s941_s15   ;;  %s720_s14 = sphi %s753_s14, %s940_s14   ;;  %s716_s13 = sphi %s751_s13, %s939_s13   ;;  %s712_s12 = sphi %s749_s12, %s938_s12  }
   0x9   : > { %p44_p0 = scmp.ne.s32.totalorder %s716_s13, %s712_s12  ;;  %p45_p1 = scmp.eq.s32.totalorder %s770_s16, 0 }
   0xa   : > { %p89_p2 = scmp.eq.s32.totalorder %s770_s16, 1  ;;  %p95_p3 = scmp.eq.s32.totalorder %s449_s17, 1 }
   0xb   : > { %p779_p4 = por %p45_p1, %p44_p0  ;;  %p450_p5 = scmp.ge.s32.totalorder %s724_s15, 1 }
   0xc   : > { %p784_p6 = por %p95_p3, %p44_p0  ;;  %p128_p7 = scmp.lt.s32.totalorder %s724_s15, 3 }
   0xd   : > { %s139_s22 = sshll.u32 %s929_s1, 4  ;;  %s726_s24 = smov [#allocation5]   ;;  %s140_s22 = int_to_ptr.hbm [resolvable:$true] %s139_s22 }
   0xe   : > { %p792_p8 = pnand %p450_p5, %p128_p7  ;;  %s141_s25 = sshll.u32 %s726_s24, 4  ;;  %s142_s25 = int_to_ptr.vmem [resolvable:$true] %s141_s25 }
   0xf   : > { %s802_s26 = sadd.s32 1, %s724_s15   ;;  %s727_s27 = smov 64  }
  0x10   : > { %p508_p9 = pneg %p792_p8  ;;  %s728_s28 = smov 4  }
  0x11   : > { %s28_s29 = ssub.s32 %s724_s15, %s802_s26  ;;  %s31_s30 = sadd.s32 1, %s720_s14 }
  0x12   : > { %p509_p10 = pnand %p508_p9, %p45_p1  ;;  %p29_p12 = scmp.eq.s32.totalorder %s28_s29, 0 }
  0x13   : > { %p38_p13 = scmp.ne.s32.totalorder %s720_s14, %s716_s13  ;;  %p39_p0 = scmp.eq.s32.totalorder %s724_s15, 0 }
  0x14   : > { %511 = dma.hbm_to_vmem [thread:$0]  (!%p509_p10), %s140_s22, 512, %s142_s25, [#allocation6], %s727_s27, %s727_s27, %s728_s28  }
  0x15   : > { %s814_s4 = scalar_select %p29_p12, %s720_s14, %s31_s30  }
  0x16   : > { %p818_p3 = por %p89_p2, %p38_p13  ;;  %p524_p5 = scmp.lt.s32.totalorder %s724_s15, 2 }
  0x17   : > { %s155_s6 = sand.u32 1, %s720_s14   ;;  %s487_s7 = sshll.u32 %s724_s15, 4 }
  0x18   : > { %p40_p7 = por %p39_p0, %p38_p13  ;;  %s453_s8 = sshll.u32 %s155_s6, 4 }
  0x19   : > { %s164_s11 = scalar_lea.hbm %s928_s0, %s487_s7  ;;  %s159_s20 = scalar_lea.vmem [#allocation2], %s453_s8 }
  0x1a   : > { %s165_s17 = sshll.u32 %s164_s11, 4  ;;  %s167_s21 = sshll.u32 %s159_s20, 4  ;;  %s166_s17 = int_to_ptr.hbm [resolvable:$true] %s165_s17  ;;  %s168_s21 = int_to_ptr.vmem [resolvable:$true] %s167_s21 }
  0x1b   : > { %p828_p9 = pnand %p524_p5, %p40_p7  ;;  %s156_s24 = scalar_lea.sflag [#allocation3], %s155_s6 }
  0x1c   : > { %s592_s25 = sshra.s32 %s166_s17, 4  ;;  %s599_s8 = scalar_lea.hbm %s928_s0, 32  ;;  %s593_s25 = int_to_ptr.hbm [resolvable:$true] %s592_s25 }
  0x1d   : > { %s594_s29 = scalar_lea.hbm %s593_s25, 16  ;;  %p596_p10 = pneg %p828_p9 }
  0x1e   : > { %p595_p2 = scmp.ne.s32.totalorder %s593_s25, %s594_s29  ;;  %p600_p0 = scmp.lt.s32.totalorder %s593_s25, %s928_s0 }
  0x1f   : > { %p601_p5 = scmp.lt.s32.totalorder %s599_s8, %s594_s29 }
  0x20   : > { %p597_p12 = pnand %p596_p10, %p595_p2 }
  0x21   : > { %p602_p7 = por %p601_p5, %p600_p0 }
  0x22   : > { %p598_p13 = pneg %p597_p12 }
  0x24   : > { %p603_p11 = pnand %p602_p7, %p598_p13 }
  0x26   : > { %606 = shalt.err (!%p603_p11)
}
  0x27   : > { %515 = dma.hbm_to_vmem [thread:$0]  (!%p828_p9), %s166_s17, 256, %s168_s21, %s156_s24, %s727_s27, %s727_s27, %s728_s28  }
  0x28   : > { %179 = sbr.rel (%p792_p8) target bundleno = 231 (0xe7), region = 28  ;;  %s848_s6 = sand.u32 (!%p792_p8), 1, %s716_s13  }
  0x29   : > { %s457_s11 = sshll.u32 (!%p792_p8), %s848_s6, 4  ;;  %s182_s20 = scalar_lea.sflag (!%p792_p8), [#allocation3], %s848_s6 }
  0x2a   : > { %s185_s25 = scalar_lea.vmem (!%p792_p8), [#allocation2], %s457_s11 }
  0x2d   : > { %695 = dma.done.wait (%p779_p4), %s182_s20, 256  }
  0x2e   : > { %697 = vsyncadd (%p779_p4), %s182_s20, 4294967040 }
  0x2f   : > { %699 = dma.done.wait (%p45_p1), [#allocation6], 512  }
  0x30   : > { %701 = vsyncadd (%p45_p1), [#allocation6], 4294966784  ;;  %v493_v0 = vld [vmem:[#allocation5 + $0x18] sm:$0xff]  ;;  %v492_v1 = vld [vmem:[#allocation5 + $0x10] sm:$0xff]  ;;  %vm265_vm0 = vcmask 523264   ;;  %s328_s27 = scalar_lea.hbm %s930_s2, %s770_s16  ;;  %s341_s21 = scalar_lea.hbm %s931_s3, %s770_s16 }
  0x31   : > { %276 = vmatpush.bf16.msra.mxu0 %v493_v0  ;;  %494 = vmatpush.bf16.msra.mxu1 %v493_v0  ;;  %v491_v2 = vld [vmem:[#allocation5 + $0x8] sm:$0xff]  ;;  %v490_v3 = vld [vmem:[#allocation5] sm:$0xff]  ;;  %s210_s22 = scalar_lea.vmem [#allocation7], %s848_s6  ;;  %s871_s29 = sshll.u32 %s328_s27, 4  ;;  %s333_s29 = int_to_ptr.hbm [resolvable:$true] %s871_s29 }
  0x32   : > { %v488_v4 = vld [vmem:[%s185_s25] sm:$0xff]  ;;  %v489_v5 = vld [vmem:[%s185_s25 + $0x8] sm:$0xff]  ;;  %s869_s24 = sshll.u32 %s210_s22, 4  ;;  %s216_s30 = scalar_lea.vmem [#allocation8], %s848_s6  ;;  %s331_s24 = int_to_ptr.vmem [resolvable:$true] %s869_s24 }
  0x33   : > { %s874_s7 = sshll.u32 %s216_s30, 4  ;;  %s876_s8 = sshll.u32 %s341_s21, 4  ;;  %s344_s7 = int_to_ptr.vmem [resolvable:$true] %s874_s7  ;;  %s346_s8 = int_to_ptr.hbm [resolvable:$true] %s876_s8 }
  0x34   : > { %s316_s16 = scalar_lea.sflag [#allocation4], %s848_s6  ;;  %s636_s9 = sshra.s32 %s333_s29, 4  ;;  %s637_s9 = int_to_ptr.hbm [resolvable:$true] %s636_s9 }
  0x35   : > { %277 = vmatpush.bf16.msra.mxu0 %v492_v1  ;;  %495 = vmatpush.bf16.msra.mxu1 %v492_v1  ;;  %s638_s10 = scalar_lea.hbm %s637_s9, 1  ;;  %s642_s25 = scalar_lea.hbm %s930_s2, 2 }
  0x36   : > { %p639_p1 = scmp.ne.s32.totalorder %s637_s9, %s638_s10  ;;  %p643_p11 = scmp.lt.s32.totalorder %s637_s9, %s930_s2 }
  0x37   : > { %p644_p9 = scmp.lt.s32.totalorder %s642_s25, %s638_s10 }
  0x38   : > { %p640_p4 = pnand %p639_p1, %p818_p3 }
  0x39   : > { %278 = vmatpush.bf16.msra.mxu0 %v491_v2  ;;  %496 = vmatpush.bf16.msra.mxu1 %v491_v2  ;;  %p645_p2 = por %p644_p9, %p643_p11 }
  0x3a   : > { %p641_p8 = pneg %p640_p4 }
  0x3c   : > { %p646_p10 = pnand %p645_p2, %p641_p8 }
  0x3d   : > { %279 = vmatpush.bf16.msra.mxu0 %v490_v3  ;;  %497 = vmatpush.bf16.msra.mxu1 %v490_v3 }
  0x40   : > { %483 = vmatmul.msk.bf16.vlgmr.msra.gmra.mxu0 %vm265_vm0, %v488_v4  ;;  %484 = vmatmul.msk.bf16.vlgmr.msra.gmra.mxu1 %vm265_vm0, %v489_v5 }
  0xbd   : > { %v281_v6 = vpop.f32.mrf.mxu0  ;;  %v286_v7 = vpop.f32.mrf.mxu1 }
  0xbe   : > { %v301_v9 = vmul.f32 %v281_v6, %v281_v6  ;;  %v303_v13 = vmul.f32 %v286_v7, %v286_v7 }
  0xc5   : > { %v283_v8 = vpop.f32.mrf.mxu0  ;;  %v288_v12 = vpop.f32.mrf.mxu1 }
  0xc6   : > { %v291_v10 = vadd.f32 %v283_v8, %v281_v6  ;;  %v302_v11 = vmul.f32 %v283_v8, %v283_v8  ;;  %v304_v17 = vmul.f32 %v288_v12, %v288_v12 }
  0xc8   : > { %v305_v14 = vadd.f32 %v302_v11, %v301_v9  ;;  %v292_v15 = vadd.f32 %v291_v10, %v286_v7 }
  0xca   : > { %v293_v16 = vadd.f32 %v292_v15, %v288_v12  ;;  %v306_v18 = vadd.f32 %v305_v14, %v303_v13 }
  0xcc   : > { %v294_v19 = vrot.slane %v293_v16, 4  ;;  %v307_v20 = vadd.f32 %v306_v18, %v304_v17 }
  0xce   : > { %v295_v21 = vadd.f32 %v294_v19, %v293_v16  ;;  %v308_v22 = vrot.slane %v307_v20, 4 }
  0xd0   : > { %v296_v23 = vrot.slane %v295_v21, 2  ;;  %v309_v24 = vadd.f32 %v308_v22, %v307_v20 }
  0xd2   : > { %v297_v25 = vadd.f32 %v296_v23, %v295_v21  ;;  %v310_v26 = vrot.slane %v309_v24, 2 }
  0xd4   : > { %v298_v27 = vrot.slane %v297_v25, 1  ;;  %v311_v28 = vadd.f32 %v310_v26, %v309_v24 }
  0xd6   : > { %v299_v29 = vadd.f32 %v298_v27, %v297_v25  ;;  %v312_v30 = vrot.slane %v311_v28, 1 }
  0xd8   : > { %v313_v31 = vadd.f32 %v312_v30, %v311_v28  ;;  %300 = vst [vmem:[%s210_s22] sm:$0x1] %v299_v29 }
  0xd9   : > { %649 = shalt.err (!%p646_p10)
}
  0xda   : > { %504 = dma.vmem_to_hbm [thread:$0]  (%p818_p3), %s331_s24, 16, %s333_s29, %s316_s16   ;;  %314 = vst [vmem:[%s216_s30] sm:$0x1] %v313_v31 }
  0xdb   : > { %s320_s27 = scalar_lea.sflag [#allocation9], %s848_s6  ;;  %s664_s28 = sshra.s32 %s346_s8, 4  ;;  %s665_s28 = int_to_ptr.hbm [resolvable:$true] %s664_s28 }
  0xdc   : > { %s666_s17 = scalar_lea.hbm %s665_s28, 1  ;;  %s670_s9 = scalar_lea.hbm %s931_s3, 2 }
  0xdd   : > { %p667_p12 = scmp.ne.s32.totalorder %s665_s28, %s666_s17  ;;  %p671_p5 = scmp.lt.s32.totalorder %s665_s28, %s931_s3 }
  0xde   : > { %p672_p7 = scmp.lt.s32.totalorder %s670_s9, %s666_s17 }
  0xdf   : > { %p668_p13 = pnand %p667_p12, %p818_p3 }
  0xe0   : > { %p673_p1 = por %p672_p7, %p671_p5 }
  0xe1   : > { %p669_p0 = pneg %p668_p13 }
  0xe3   : > { %p674_p4 = pnand %p673_p1, %p669_p0 }
  0xe5   : > { %677 = shalt.err (!%p674_p4)
}
  0xe6   : > { %505 = dma.vmem_to_hbm [thread:$0]  (%p818_p3), %s344_s7, 16, %s346_s8, %s320_s27  }
  0xe7 PF: > { %s357_s6 = sand.u32 1, %s712_s12   ;;  %p937_p8 = scmp.ge.s32.totalorder %s724_s15, 2 }
  0xe8   : > { %s358_s24 = scalar_lea.sflag [#allocation4], %s357_s6 }
  0xe9   : > { %p517_p11 = pnand %p937_p8, %p784_p6 }
  0xeb   : > { %p518_p9 = pneg %p517_p11 }
  0xed   : > { %703 = dma.done.wait (%p518_p9), %s358_s24, 16  }
  0xee   : > { %705 = vsyncadd (%p518_p9), %s358_s24, 4294967280  ;;  %s367_s29 = scalar_lea.sflag [#allocation9], %s357_s6 }
  0xef   : > { %707 = dma.done.wait (%p518_p9), %s367_s29, 16  }
  0xf0   : > { %709 = vsyncadd (%p518_p9), %s367_s29, 4294967280  ;;  %p21_p3 = scmp.ge.s32.totalorder %s802_s26, 4   ;;  %s938_s12 = smov %s716_s13 }
  0xf1   : > { %s939_s13 = smov %s720_s14  ;;  %s940_s14 = smov %s814_s4 }
  0xf2   : > { %s941_s15 = smov %s802_s26  ;;  %23 = sbr.rel (!%p21_p3) target bundleno = 8 (0x8), region = 94 }
  0xf7   :  { %372 = vsyncpa [#allocation3], 1 }
  0xf8   :  { %374 = vsyncpa [#allocation3 + $0x1], 1 }
  0xf9   :  { %375 = vsyncpa [#allocation6], 1 }
  0xfa   :  { %376 = vsyncpa [#allocation4], 1 }
  0xfb   :  { %378 = vsyncpa [#allocation4 + $0x1], 1 }
  0xfc   :  { %379 = vsyncpa [#allocation9], 1 }
  0xfd   :  { %381 = vsyncpa [#allocation9 + $0x1], 1 }

</bundles_post_ra>
